<compile_context>
chip_gen: v5e
topology: v5e:2x2
jax: 0.10.0
libtpu: 0.0.40
codegen_flags: <defaults>
</compile_context>

<pallas_src>
import functools
import math

import jax
import jax.numpy as jnp
import numpy as np
from jax.experimental import pallas as pl
from jax.experimental.pallas import tpu as pltpu

LANE = 128
SUBLANE = 8
MXU_DTYPE = jnp.bfloat16          # MXU operand dtype; accumulation stays f32


def _round_up(v, m):
    return (v + m - 1) // m * m


# ------------------------------ Pallas kernel --------------------------------
def gcnii_jk_kernel(adj_ref, x_ref, w0t_ref, b0_ref, wstack_ref,
                    bn_scale_ref, bn_shift_ref, wjk_ref, bjk_ref, o_ref, *,
                    num_layers, alpha, betas, activation, jk_mode,
                    agg_first, apply_bn):
    """Entire GCNIIwithJK forward (eval mode), unrolled over layers in-kernel."""
    f32 = jnp.float32

    def act(v):
        if activation == "relu":
            return jnp.maximum(v, 0.0)
        if activation == "leaky_relu":
            return jnp.where(v >= 0, v, 0.01 * v)
        if activation == "tanh":
            return jnp.tanh(v)
        return v

    def mm(a, b):  # bf16 operands on the MXU, f32 accumulation
        return jnp.dot(a.astype(MXU_DTYPE), b.astype(MXU_DTYPE),
                       preferred_element_type=f32)

    adj = adj_ref[...]          # (NP, NP)  bf16 -- resident for the whole stack
    x = x_ref[...]              # (NP, CIP) bf16
    w0t = w0t_ref[...]          # (CIP, CP) bf16

    # ---- lins[0]: GCNConv   z0 = A_hat X W0^T + b0
    if agg_first:               # in_ch < H: aggregate on the narrower feature width
        z = mm(mm(adj, x), w0t) + b0_ref[...]
    else:
        z = mm(adj, mm(x, w0t)) + b0_ref[...]
    x0 = z
    zs = []

    # ---- GCN2Conv stack (num_layers is static -> Python-unrolled)
    for i in range(num_layers):
        # dropout: eval mode -> identity
        h = mm(adj, z)                                    # A_hat @ z
        out0 = (1.0 - alpha) * h + alpha * x0             # initial residual
        z = (1.0 - betas[i]) * out0 + betas[i] * mm(out0, wstack_ref[i])
        zs.append(z)                                      # pre-BN output (for JK)
        if apply_bn[i]:
            z = z * bn_scale_ref[i] + bn_shift_ref[i]     # folded eval-mode BN
            z = act(z)
        if i % 4 == 3:                                    # JumpingKnowledge
            blk = zs[4 * (i // 4): 4 * (i // 4) + 4]
            if jk_mode == "cat":
                # cat(zs) @ W_jk^T  ==  sum_j zs[j] @ W_jk[:, jH:(j+1)H]^T
                zjk = mm(blk[0], wjk_ref[0])
                for j in range(1, 4):
                    zjk = zjk + mm(blk[j], wjk_ref[j])
                z = zjk + bjk_ref[...]
            elif jk_mode == "max":
                zm = blk[0]
                for j in range(1, 4):
                    zm = jnp.maximum(zm, blk[j])
                z = zm
            # TODO(synk): jk_mode == 'lstm' (LSTM aggregation) not implemented
            x0 = z

    o_ref[...] = z.astype(o_ref.dtype)


# -------------------------- one-time parameter prep ---------------------------
def _fold_bn(gamma, beta, rmean, rvar, eps=1e-5):
    scale = gamma / jnp.sqrt(rvar + eps)
    shift = beta - rmean * scale
    return scale, shift


def prepare_gcnii_jk(params, *, num_nodes, in_channels, hidden_channels,
                     num_layers, theta, jk_mode):
    """Pad to lane width, transpose, fold BN, cast to MXU dtype -- done once."""
    H = hidden_channels
    NP = _round_up(num_nodes, SUBLANE)
    CIP = _round_up(in_channels, LANE)
    CP = _round_up(H, LANE)

    w0, b0 = params["lin0"]                                    # (H, in_ch), (H,)
    w0t_p = jnp.zeros((CIP, CP), jnp.float32).at[:in_channels, :H].set(w0.T)
    b0_p = jnp.zeros((1, CP), jnp.float32).at[0, :H].set(b0)

    wstack = jnp.zeros((num_layers, CP, CP), jnp.float32)
    for i, w in enumerate(params["convs"]):                    # (H, H), used as z @ W
        wstack = wstack.at[i, :H, :H].set(w)

    apply_bn = tuple((i < num_layers - 1) or (i % 4 == 3) for i in range(num_layers))
    bn_scale = jnp.zeros((num_layers, 1, CP), jnp.float32)
    bn_shift = jnp.zeros((num_layers, 1, CP), jnp.float32)
    for i in range(num_layers):
        if apply_bn[i]:
            s, t = _fold_bn(*params["bns"][i])
            bn_scale = bn_scale.at[i, 0, :H].set(s)
            bn_shift = bn_shift.at[i, 0, :H].set(t)

    # JK 'cat' Linear(4H -> H): weight (H, 4H) -> blocked transpose (4, CP, CP)
    wjk_p = jnp.zeros((4, CP, CP), jnp.float32)
    bjk_p = jnp.zeros((1, CP), jnp.float32)
    if jk_mode == "cat" and "jk_lin" in params:
        wjk, bjk = params["jk_lin"]
        for j in range(4):
            wjk_p = wjk_p.at[j, :H, :H].set(wjk[:, j * H:(j + 1) * H].T)
        bjk_p = bjk_p.at[0, :H].set(bjk)

    betas = tuple(float(math.log(theta / (l + 1) + 1.0)) for l in range(num_layers))

    packed = dict(w0t=w0t_p.astype(MXU_DTYPE), b0=b0_p,
                  wstack=wstack.astype(MXU_DTYPE),
                  bn_scale=bn_scale, bn_shift=bn_shift,
                  wjk=wjk_p.astype(MXU_DTYPE), bjk=bjk_p)
    meta = dict(NP=NP, CIP=CIP, CP=CP, H=H, betas=betas, apply_bn=apply_bn,
                agg_first=in_channels < H)
    return packed, meta


# ------------------------------- forward wrapper ------------------------------
def gcnii_jk_forward(x, adj, packed, meta, *, num_layers, alpha, activation,
                     jk_mode):
    n, in_ch = x.shape
    NP, CIP, CP, H = meta["NP"], meta["CIP"], meta["CP"], meta["H"]

    adj_p = jnp.zeros((NP, NP), jnp.float32).at[:n, :n].set(adj).astype(MXU_DTYPE)
    x_p = jnp.zeros((NP, CIP), jnp.float32).at[:n, :in_ch].set(x).astype(MXU_DTYPE)

    kernel = functools.partial(
        gcnii_jk_kernel,
        num_layers=num_layers, alpha=float(alpha), betas=meta["betas"],
        activation=activation, jk_mode=jk_mode,
        agg_first=meta["agg_first"], apply_bn=meta["apply_bn"])

    def full_spec(shape):
        return pl.BlockSpec(shape, lambda i: (0,) * len(shape))

    inputs = (adj_p, x_p, packed["w0t"], packed["b0"], packed["wstack"],
              packed["bn_scale"], packed["bn_shift"], packed["wjk"],
              packed["bjk"])

    out = pl.pallas_call(
        kernel,
        out_shape=jax.ShapeDtypeStruct((NP, CP), jnp.float32),
        grid=(1,),
        in_specs=[full_spec(a.shape) for a in inputs],
        out_specs=full_spec((NP, CP)),
        compiler_params=pltpu.CompilerParams(
            dimension_semantics=("arbitrary",),
            vmem_limit_bytes=32 * 1024 * 1024),
    )(*inputs)
    return out[:n, :H]


# ------------------------------ pure-JAX reference ----------------------------
def gcnii_jk_forward_ref(x, adj, params, *, num_layers, alpha, theta, activation,
                         jk_mode, mxu_dtype=None, eps=1e-5):
    """Reference of the PyTorch forward (eval mode). If mxu_dtype is set, matmul
    operands are cast to it (mirrors the kernel's bf16-on-MXU policy)."""
    def mm(a, b):
        if mxu_dtype is not None:
            a = a.astype(mxu_dtype)
            b = b.astype(mxu_dtype)
        return jnp.dot(a, b, preferred_element_type=jnp.float32)

    def act(v):
        if activation == "relu":
            return jnp.maximum(v, 0.0)
        if activation == "leaky_relu":
            return jnp.where(v >= 0, v, 0.01 * v)
        if activation == "tanh":
            return jnp.tanh(v)
        return v

    w0, b0 = params["lin0"]
    h_ch, in_ch = w0.shape
    if in_ch < h_ch:
        z = mm(mm(adj, x), w0.T) + b0[None, :]
    else:
        z = mm(adj, mm(x, w0.T)) + b0[None, :]
    x0 = z
    zs = []
    for i in range(num_layers):
        beta_l = math.log(theta / (i + 1) + 1.0)
        h = mm(adj, z)
        out0 = (1.0 - alpha) * h + alpha * x0
        z = (1.0 - beta_l) * out0 + beta_l * mm(out0, params["convs"][i])
        zs.append(z)
        if i < num_layers - 1 or i % 4 == 3:
            gamma, bta, rmean, rvar = params["bns"][i]
            z = (z - rmean[None, :]) / jnp.sqrt(rvar[None, :] + eps)
            z = z * gamma[None, :] + bta[None, :]
            z = act(z)
        if i % 4 == 3:
            blk = zs[4 * (i // 4): 4 * (i // 4) + 4]
            if jk_mode == "cat":
                wjk, bjk = params["jk_lin"]
                z = mm(jnp.concatenate(blk, axis=-1), wjk.T) + bjk[None, :]
            elif jk_mode == "max":
                z = jnp.max(jnp.stack(blk, axis=0), axis=0)
            x0 = z
    return z


# ---------------------------------- helpers -----------------------------------
def build_norm_adj(edge_index, num_nodes):
    """Dense D^-1/2 (A + I) D^-1/2 (gcn_norm; duplicate edges accumulate)."""
    src, dst = edge_index
    a = jnp.zeros((num_nodes, num_nodes), jnp.float32)
    a = a.at[dst, src].add(1.0)
    a_hat = a + jnp.eye(num_nodes, dtype=jnp.float32)
    deg = a_hat.sum(axis=1)
    d_inv_sqrt = jnp.where(deg > 0, 1.0 / jnp.sqrt(deg), 0.0)
    return d_inv_sqrt[:, None] * a_hat * d_inv_sqrt[None, :]


def glorot(key, shape):
    fan_in, fan_out = shape[1], shape[0]
    limit = jnp.sqrt(6.0 / (fan_in + fan_out))
    return jax.random.uniform(key, shape, jnp.float32, -limit, limit)


# ------------------------------------ main -------------------------------------
if __name__ == "__main__":
    key = jax.random.PRNGKey(0)

    num_nodes = 16
    in_channels = 8
    num_hidden_channels = 32
    num_layers = 4            # >= 4 so the JumpingKnowledge('cat') path is exercised
    alpha, theta = 0.1, 0.5
    jk_mode = "cat"
    activation = "relu"

    k_x, k_src, k_dst, k_p = jax.random.split(key, 4)

    # node features
    x = jax.random.normal(k_x, (num_nodes, in_channels), jnp.float32)

    # random undirected edge set (no self loops; both directions stored)
    num_und_edges = 24
    src = jax.random.randint(k_src, (num_und_edges,), 0, num_nodes)
    dst = jax.random.randint(k_dst, (num_und_edges,), 0, num_nodes)
    keep = np.asarray(src) != np.asarray(dst)
    src = jnp.asarray(np.asarray(src)[keep])
    dst = jnp.asarray(np.asarray(dst)[keep])
    edge_index = jnp.stack(
        [jnp.concatenate([src, dst]), jnp.concatenate([dst, src])], axis=0)

    adj = build_norm_adj(edge_index, num_nodes)

    # deterministic parameters matching GCNIIwithJK.__init__ (non-VGAE, jk='cat')
    H = num_hidden_channels
    keys = jax.random.split(k_p, 16)
    w0 = glorot(keys[0], (H, in_channels))                       # lins[0] (GCNConv)
    b0 = 0.1 * jax.random.normal(keys[1], (H,), jnp.float32)
    convs = [glorot(keys[2 + i], (H, H)) for i in range(num_layers)]  # GCN2Conv W_l
    bns = []
    for i in range(num_layers):
        kg = keys[6 + i]
        gamma = 1.0 + 0.1 * jax.random.normal(kg, (H,), jnp.float32)
        beta = 0.1 * jax.random.normal(jax.random.fold_in(kg, 1), (H,), jnp.float32)
        rmean = 0.05 * jax.random.normal(jax.random.fold_in(kg, 2), (H,), jnp.float32)
        rvar = 1.0 + 0.1 * jax.random.uniform(jax.random.fold_in(kg, 3), (H,),
                                              jnp.float32)
        bns.append((gamma, beta, rmean, rvar))
    wjk = glorot(keys[10], (H, 4 * H))                           # lins[-1] (cat JK)
    bjk = 0.1 * jax.random.normal(keys[11], (H,), jnp.float32)
    params = {"lin0": (w0, b0), "convs": convs, "bns": bns, "jk_lin": (wjk, bjk)}

    packed, meta = prepare_gcnii_jk(
        params, num_nodes=num_nodes, in_channels=in_channels,
        hidden_channels=H, num_layers=num_layers, theta=theta, jk_mode=jk_mode)

    z = gcnii_jk_forward(x, adj, packed, meta, num_layers=num_layers,
                         alpha=alpha, activation=activation, jk_mode=jk_mode)
    z = jax.block_until_ready(z)

    # reference with the same precision policy (bf16 MXU operands, f32 accumulate)
    z_ref_bf16 = gcnii_jk_forward_ref(
        x, adj, params, num_layers=num_layers, alpha=alpha, theta=theta,
        activation=activation, jk_mode=jk_mode, mxu_dtype=MXU_DTYPE)
    np.testing.assert_allclose(np.asarray(z), np.asarray(z_ref_bf16),
                               rtol=5e-3, atol=5e-3)

    # full-f32 reference (true module math); loose tol covers bf16 MXU operands
    z_ref_f32 = gcnii_jk_forward_ref(
        x, adj, params, num_layers=num_layers, alpha=alpha, theta=theta,
        activation=activation, jk_mode=jk_mode, mxu_dtype=None)
    np.testing.assert_allclose(np.asarray(z), np.asarray(z_ref_f32),
                               rtol=1e-1, atol=1e-1)

    print("KERNEL_OK")
</pallas_src>

<mosaic_0001>
module attributes {stable_mosaic.version = 11 : i64} {
  func.func @gcnii_jk_kernel(%arg0: i32, %arg1: memref<16x16xbf16, #tpu.memory_space<vmem>>, %arg2: memref<16x128xbf16, #tpu.memory_space<vmem>>, %arg3: memref<128x128xbf16, #tpu.memory_space<vmem>>, %arg4: memref<1x128xf32, #tpu.memory_space<vmem>>, %arg5: memref<4x128x128xbf16, #tpu.memory_space<vmem>>, %arg6: memref<4x1x128xf32, #tpu.memory_space<vmem>>, %arg7: memref<4x1x128xf32, #tpu.memory_space<vmem>>, %arg8: memref<4x128x128xbf16, #tpu.memory_space<vmem>>, %arg9: memref<1x128xf32, #tpu.memory_space<vmem>>, %arg10: memref<16x128xf32, #tpu.memory_space<vmem>>) attributes {dimension_semantics = [#tpu.dimension_semantics<arbitrary>], iteration_bounds = array<i64: 1>, scalar_prefetch = 0 : i64, scratch_operands = 0 : i64, tpu.core_type = #tpu.core_type<tc>, window_params = [{pipeline_mode = #tpu.pipeline_mode<synchronous>, transform_indices = @transform_0, window_bounds = array<i64: 16, 16>}, {pipeline_mode = #tpu.pipeline_mode<synchronous>, transform_indices = @transform_1, window_bounds = array<i64: 16, 128>}, {pipeline_mode = #tpu.pipeline_mode<synchronous>, transform_indices = @transform_2, window_bounds = array<i64: 128, 128>}, {pipeline_mode = #tpu.pipeline_mode<synchronous>, transform_indices = @transform_3, window_bounds = array<i64: 1, 128>}, {pipeline_mode = #tpu.pipeline_mode<synchronous>, transform_indices = @transform_4, window_bounds = array<i64: 4, 128, 128>}, {pipeline_mode = #tpu.pipeline_mode<synchronous>, transform_indices = @transform_5, window_bounds = array<i64: 4, 1, 128>}, {pipeline_mode = #tpu.pipeline_mode<synchronous>, transform_indices = @transform_6, window_bounds = array<i64: 4, 1, 128>}, {pipeline_mode = #tpu.pipeline_mode<synchronous>, transform_indices = @transform_7, window_bounds = array<i64: 4, 128, 128>}, {pipeline_mode = #tpu.pipeline_mode<synchronous>, transform_indices = @transform_8, window_bounds = array<i64: 1, 128>}, {pipeline_mode = #tpu.pipeline_mode<synchronous>, transform_indices = @transform_9, window_bounds = array<i64: 16, 128>}]} {
    %c0 = arith.constant 0 : index
    %c0_0 = arith.constant 0 : index
    %0 = vector.load %arg1[%c0, %c0_0] : memref<16x16xbf16, #tpu.memory_space<vmem>>, vector<16x16xbf16>
    %c0_1 = arith.constant 0 : index
    %c0_2 = arith.constant 0 : index
    %1 = vector.load %arg2[%c0_1, %c0_2] : memref<16x128xbf16, #tpu.memory_space<vmem>>, vector<16x128xbf16>
    %c0_3 = arith.constant 0 : index
    %c0_4 = arith.constant 0 : index
    %2 = vector.load %arg3[%c0_3, %c0_4] : memref<128x128xbf16, #tpu.memory_space<vmem>>, vector<128x128xbf16>
    %cst = arith.constant dense<0.000000e+00> : vector<16x128xf32>
    %3 = tpu.matmul %0, %1, %cst {dimension_numbers = #tpu.dot_dimension_numbers<[1], [0], [0], [1], [0, 0, 1, 1], [], []>} : vector<16x16xbf16>, vector<16x128xbf16>, vector<16x128xf32> -> vector<16x128xf32>
    %4 = arith.truncf %3 : vector<16x128xf32> to vector<16x128xbf16>
    %cst_5 = arith.constant dense<0.000000e+00> : vector<16x128xf32>
    %5 = tpu.matmul %4, %2, %cst_5 {dimension_numbers = #tpu.dot_dimension_numbers<[1], [0], [0], [1], [0, 0, 1, 1], [], []>} : vector<16x128xbf16>, vector<128x128xbf16>, vector<16x128xf32> -> vector<16x128xf32>
    %c0_6 = arith.constant 0 : index
    %c0_7 = arith.constant 0 : index
    %6 = vector.load %arg4[%c0_6, %c0_7] : memref<1x128xf32, #tpu.memory_space<vmem>>, vector<1x128xf32>
    %7 = vector.broadcast %6 : vector<1x128xf32> to vector<16x128xf32>
    %8 = arith.addf %5, %7 : vector<16x128xf32>
    %9 = arith.truncf %8 : vector<16x128xf32> to vector<16x128xbf16>
    %cst_8 = arith.constant dense<0.000000e+00> : vector<16x128xf32>
    %10 = tpu.matmul %0, %9, %cst_8 {dimension_numbers = #tpu.dot_dimension_numbers<[1], [0], [0], [1], [0, 0, 1, 1], [], []>} : vector<16x16xbf16>, vector<16x128xbf16>, vector<16x128xf32> -> vector<16x128xf32>
    %cst_9 = arith.constant 0.899999976 : f32
    %11 = vector.broadcast %cst_9 : f32 to vector<16x128xf32>
    %12 = arith.mulf %11, %10 : vector<16x128xf32>
    %cst_10 = arith.constant 1.000000e-01 : f32
    %13 = vector.broadcast %cst_10 : f32 to vector<16x128xf32>
    %14 = arith.mulf %13, %8 : vector<16x128xf32>
    %15 = arith.addf %12, %14 : vector<16x128xf32>
    %cst_11 = arith.constant 0.594534874 : f32
    %16 = vector.broadcast %cst_11 : f32 to vector<16x128xf32>
    %17 = arith.mulf %16, %15 : vector<16x128xf32>
    %c0_12 = arith.constant 0 : index
    %c0_13 = arith.constant 0 : index
    %c0_14 = arith.constant 0 : index
    %18 = vector.load %arg5[%c0_12, %c0_13, %c0_14] : memref<4x128x128xbf16, #tpu.memory_space<vmem>>, vector<1x128x128xbf16>
    %19 = vector.shape_cast %18 : vector<1x128x128xbf16> to vector<128x128xbf16>
    %20 = arith.truncf %15 : vector<16x128xf32> to vector<16x128xbf16>
    %cst_15 = arith.constant dense<0.000000e+00> : vector<16x128xf32>
    %21 = tpu.matmul %20, %19, %cst_15 {dimension_numbers = #tpu.dot_dimension_numbers<[1], [0], [0], [1], [0, 0, 1, 1], [], []>} : vector<16x128xbf16>, vector<128x128xbf16>, vector<16x128xf32> -> vector<16x128xf32>
    %cst_16 = arith.constant 0.405465096 : f32
    %22 = vector.broadcast %cst_16 : f32 to vector<16x128xf32>
    %23 = arith.mulf %22, %21 : vector<16x128xf32>
    %24 = arith.addf %17, %23 : vector<16x128xf32>
    %c0_17 = arith.constant 0 : index
    %c0_18 = arith.constant 0 : index
    %c0_19 = arith.constant 0 : index
    %25 = vector.load %arg6[%c0_17, %c0_18, %c0_19] : memref<4x1x128xf32, #tpu.memory_space<vmem>>, vector<1x1x128xf32>
    %26 = vector.shape_cast %25 : vector<1x1x128xf32> to vector<1x128xf32>
    %27 = vector.broadcast %26 : vector<1x128xf32> to vector<16x128xf32>
    %28 = arith.mulf %24, %27 : vector<16x128xf32>
    %c0_20 = arith.constant 0 : index
    %c0_21 = arith.constant 0 : index
    %c0_22 = arith.constant 0 : index
    %29 = vector.load %arg7[%c0_20, %c0_21, %c0_22] : memref<4x1x128xf32, #tpu.memory_space<vmem>>, vector<1x1x128xf32>
    %30 = vector.shape_cast %29 : vector<1x1x128xf32> to vector<1x128xf32>
    %31 = vector.broadcast %30 : vector<1x128xf32> to vector<16x128xf32>
    %32 = arith.addf %28, %31 : vector<16x128xf32>
    %cst_23 = arith.constant 0.000000e+00 : f32
    %33 = vector.broadcast %cst_23 : f32 to vector<16x128xf32>
    %34 = arith.maximumf %32, %33 : vector<16x128xf32>
    %35 = arith.truncf %34 : vector<16x128xf32> to vector<16x128xbf16>
    %cst_24 = arith.constant dense<0.000000e+00> : vector<16x128xf32>
    %36 = tpu.matmul %0, %35, %cst_24 {dimension_numbers = #tpu.dot_dimension_numbers<[1], [0], [0], [1], [0, 0, 1, 1], [], []>} : vector<16x16xbf16>, vector<16x128xbf16>, vector<16x128xf32> -> vector<16x128xf32>
    %cst_25 = arith.constant 0.899999976 : f32
    %37 = vector.broadcast %cst_25 : f32 to vector<16x128xf32>
    %38 = arith.mulf %37, %36 : vector<16x128xf32>
    %cst_26 = arith.constant 1.000000e-01 : f32
    %39 = vector.broadcast %cst_26 : f32 to vector<16x128xf32>
    %40 = arith.mulf %39, %8 : vector<16x128xf32>
    %41 = arith.addf %38, %40 : vector<16x128xf32>
    %cst_27 = arith.constant 0.776856422 : f32
    %42 = vector.broadcast %cst_27 : f32 to vector<16x128xf32>
    %43 = arith.mulf %42, %41 : vector<16x128xf32>
    %c1 = arith.constant 1 : index
    %c0_28 = arith.constant 0 : index
    %c0_29 = arith.constant 0 : index
    %44 = vector.load %arg5[%c1, %c0_28, %c0_29] : memref<4x128x128xbf16, #tpu.memory_space<vmem>>, vector<1x128x128xbf16>
    %45 = vector.shape_cast %44 : vector<1x128x128xbf16> to vector<128x128xbf16>
    %46 = arith.truncf %41 : vector<16x128xf32> to vector<16x128xbf16>
    %cst_30 = arith.constant dense<0.000000e+00> : vector<16x128xf32>
    %47 = tpu.matmul %46, %45, %cst_30 {dimension_numbers = #tpu.dot_dimension_numbers<[1], [0], [0], [1], [0, 0, 1, 1], [], []>} : vector<16x128xbf16>, vector<128x128xbf16>, vector<16x128xf32> -> vector<16x128xf32>
    %cst_31 = arith.constant 0.223143548 : f32
    %48 = vector.broadcast %cst_31 : f32 to vector<16x128xf32>
    %49 = arith.mulf %48, %47 : vector<16x128xf32>
    %50 = arith.addf %43, %49 : vector<16x128xf32>
    %c1_32 = arith.constant 1 : index
    %c0_33 = arith.constant 0 : index
    %c0_34 = arith.constant 0 : index
    %51 = vector.load %arg6[%c1_32, %c0_33, %c0_34] : memref<4x1x128xf32, #tpu.memory_space<vmem>>, vector<1x1x128xf32>
    %52 = vector.shape_cast %51 : vector<1x1x128xf32> to vector<1x128xf32>
    %53 = vector.broadcast %52 : vector<1x128xf32> to vector<16x128xf32>
    %54 = arith.mulf %50, %53 : vector<16x128xf32>
    %c1_35 = arith.constant 1 : index
    %c0_36 = arith.constant 0 : index
    %c0_37 = arith.constant 0 : index
    %55 = vector.load %arg7[%c1_35, %c0_36, %c0_37] : memref<4x1x128xf32, #tpu.memory_space<vmem>>, vector<1x1x128xf32>
    %56 = vector.shape_cast %55 : vector<1x1x128xf32> to vector<1x128xf32>
    %57 = vector.broadcast %56 : vector<1x128xf32> to vector<16x128xf32>
    %58 = arith.addf %54, %57 : vector<16x128xf32>
    %cst_38 = arith.constant 0.000000e+00 : f32
    %59 = vector.broadcast %cst_38 : f32 to vector<16x128xf32>
    %60 = arith.maximumf %58, %59 : vector<16x128xf32>
    %61 = arith.truncf %60 : vector<16x128xf32> to vector<16x128xbf16>
    %cst_39 = arith.constant dense<0.000000e+00> : vector<16x128xf32>
    %62 = tpu.matmul %0, %61, %cst_39 {dimension_numbers = #tpu.dot_dimension_numbers<[1], [0], [0], [1], [0, 0, 1, 1], [], []>} : vector<16x16xbf16>, vector<16x128xbf16>, vector<16x128xf32> -> vector<16x128xf32>
    %cst_40 = arith.constant 0.899999976 : f32
    %63 = vector.broadcast %cst_40 : f32 to vector<16x128xf32>
    %64 = arith.mulf %63, %62 : vector<16x128xf32>
    %cst_41 = arith.constant 1.000000e-01 : f32
    %65 = vector.broadcast %cst_41 : f32 to vector<16x128xf32>
    %66 = arith.mulf %65, %8 : vector<16x128xf32>
    %67 = arith.addf %64, %66 : vector<16x128xf32>
    %cst_42 = arith.constant 0.845849335 : f32
    %68 = vector.broadcast %cst_42 : f32 to vector<16x128xf32>
    %69 = arith.mulf %68, %67 : vector<16x128xf32>
    %c2 = arith.constant 2 : index
    %c0_43 = arith.constant 0 : index
    %c0_44 = arith.constant 0 : index
    %70 = vector.load %arg5[%c2, %c0_43, %c0_44] : memref<4x128x128xbf16, #tpu.memory_space<vmem>>, vector<1x128x128xbf16>
    %71 = vector.shape_cast %70 : vector<1x128x128xbf16> to vector<128x128xbf16>
    %72 = arith.truncf %67 : vector<16x128xf32> to vector<16x128xbf16>
    %cst_45 = arith.constant dense<0.000000e+00> : vector<16x128xf32>
    %73 = tpu.matmul %72, %71, %cst_45 {dimension_numbers = #tpu.dot_dimension_numbers<[1], [0], [0], [1], [0, 0, 1, 1], [], []>} : vector<16x128xbf16>, vector<128x128xbf16>, vector<16x128xf32> -> vector<16x128xf32>
    %cst_46 = arith.constant 0.15415068 : f32
    %74 = vector.broadcast %cst_46 : f32 to vector<16x128xf32>
    %75 = arith.mulf %74, %73 : vector<16x128xf32>
    %76 = arith.addf %69, %75 : vector<16x128xf32>
    %c2_47 = arith.constant 2 : index
    %c0_48 = arith.constant 0 : index
    %c0_49 = arith.constant 0 : index
    %77 = vector.load %arg6[%c2_47, %c0_48, %c0_49] : memref<4x1x128xf32, #tpu.memory_space<vmem>>, vector<1x1x128xf32>
    %78 = vector.shape_cast %77 : vector<1x1x128xf32> to vector<1x128xf32>
    %79 = vector.broadcast %78 : vector<1x128xf32> to vector<16x128xf32>
    %80 = arith.mulf %76, %79 : vector<16x128xf32>
    %c2_50 = arith.constant 2 : index
    %c0_51 = arith.constant 0 : index
    %c0_52 = arith.constant 0 : index
    %81 = vector.load %arg7[%c2_50, %c0_51, %c0_52] : memref<4x1x128xf32, #tpu.memory_space<vmem>>, vector<1x1x128xf32>
    %82 = vector.shape_cast %81 : vector<1x1x128xf32> to vector<1x128xf32>
    %83 = vector.broadcast %82 : vector<1x128xf32> to vector<16x128xf32>
    %84 = arith.addf %80, %83 : vector<16x128xf32>
    %cst_53 = arith.constant 0.000000e+00 : f32
    %85 = vector.broadcast %cst_53 : f32 to vector<16x128xf32>
    %86 = arith.maximumf %84, %85 : vector<16x128xf32>
    %87 = arith.truncf %86 : vector<16x128xf32> to vector<16x128xbf16>
    %cst_54 = arith.constant dense<0.000000e+00> : vector<16x128xf32>
    %88 = tpu.matmul %0, %87, %cst_54 {dimension_numbers = #tpu.dot_dimension_numbers<[1], [0], [0], [1], [0, 0, 1, 1], [], []>} : vector<16x16xbf16>, vector<16x128xbf16>, vector<16x128xf32> -> vector<16x128xf32>
    %cst_55 = arith.constant 0.899999976 : f32
    %89 = vector.broadcast %cst_55 : f32 to vector<16x128xf32>
    %90 = arith.mulf %89, %88 : vector<16x128xf32>
    %cst_56 = arith.constant 1.000000e-01 : f32
    %91 = vector.broadcast %cst_56 : f32 to vector<16x128xf32>
    %92 = arith.mulf %91, %8 : vector<16x128xf32>
    %93 = arith.addf %90, %92 : vector<16x128xf32>
    %cst_57 = arith.constant 0.882216989 : f32
    %94 = vector.broadcast %cst_57 : f32 to vector<16x128xf32>
    %95 = arith.mulf %94, %93 : vector<16x128xf32>
    %c3 = arith.constant 3 : index
    %c0_58 = arith.constant 0 : index
    %c0_59 = arith.constant 0 : index
    %96 = vector.load %arg5[%c3, %c0_58, %c0_59] : memref<4x128x128xbf16, #tpu.memory_space<vmem>>, vector<1x128x128xbf16>
    %97 = vector.shape_cast %96 : vector<1x128x128xbf16> to vector<128x128xbf16>
    %98 = arith.truncf %93 : vector<16x128xf32> to vector<16x128xbf16>
    %cst_60 = arith.constant dense<0.000000e+00> : vector<16x128xf32>
    %99 = tpu.matmul %98, %97, %cst_60 {dimension_numbers = #tpu.dot_dimension_numbers<[1], [0], [0], [1], [0, 0, 1, 1], [], []>} : vector<16x128xbf16>, vector<128x128xbf16>, vector<16x128xf32> -> vector<16x128xf32>
    %cst_61 = arith.constant 0.117783032 : f32
    %100 = vector.broadcast %cst_61 : f32 to vector<16x128xf32>
    %101 = arith.mulf %100, %99 : vector<16x128xf32>
    %102 = arith.addf %95, %101 : vector<16x128xf32>
    %c0_62 = arith.constant 0 : index
    %c0_63 = arith.constant 0 : index
    %c0_64 = arith.constant 0 : index
    %103 = vector.load %arg8[%c0_62, %c0_63, %c0_64] : memref<4x128x128xbf16, #tpu.memory_space<vmem>>, vector<1x128x128xbf16>
    %104 = vector.shape_cast %103 : vector<1x128x128xbf16> to vector<128x128xbf16>
    %105 = arith.truncf %24 : vector<16x128xf32> to vector<16x128xbf16>
    %cst_65 = arith.constant dense<0.000000e+00> : vector<16x128xf32>
    %106 = tpu.matmul %105, %104, %cst_65 {dimension_numbers = #tpu.dot_dimension_numbers<[1], [0], [0], [1], [0, 0, 1, 1], [], []>} : vector<16x128xbf16>, vector<128x128xbf16>, vector<16x128xf32> -> vector<16x128xf32>
    %c1_66 = arith.constant 1 : index
    %c0_67 = arith.constant 0 : index
    %c0_68 = arith.constant 0 : index
    %107 = vector.load %arg8[%c1_66, %c0_67, %c0_68] : memref<4x128x128xbf16, #tpu.memory_space<vmem>>, vector<1x128x128xbf16>
    %108 = vector.shape_cast %107 : vector<1x128x128xbf16> to vector<128x128xbf16>
    %109 = arith.truncf %50 : vector<16x128xf32> to vector<16x128xbf16>
    %cst_69 = arith.constant dense<0.000000e+00> : vector<16x128xf32>
    %110 = tpu.matmul %109, %108, %cst_69 {dimension_numbers = #tpu.dot_dimension_numbers<[1], [0], [0], [1], [0, 0, 1, 1], [], []>} : vector<16x128xbf16>, vector<128x128xbf16>, vector<16x128xf32> -> vector<16x128xf32>
    %111 = arith.addf %106, %110 : vector<16x128xf32>
    %c2_70 = arith.constant 2 : index
    %c0_71 = arith.constant 0 : index
    %c0_72 = arith.constant 0 : index
    %112 = vector.load %arg8[%c2_70, %c0_71, %c0_72] : memref<4x128x128xbf16, #tpu.memory_space<vmem>>, vector<1x128x128xbf16>
    %113 = vector.shape_cast %112 : vector<1x128x128xbf16> to vector<128x128xbf16>
    %114 = arith.truncf %76 : vector<16x128xf32> to vector<16x128xbf16>
    %cst_73 = arith.constant dense<0.000000e+00> : vector<16x128xf32>
    %115 = tpu.matmul %114, %113, %cst_73 {dimension_numbers = #tpu.dot_dimension_numbers<[1], [0], [0], [1], [0, 0, 1, 1], [], []>} : vector<16x128xbf16>, vector<128x128xbf16>, vector<16x128xf32> -> vector<16x128xf32>
    %116 = arith.addf %111, %115 : vector<16x128xf32>
    %c3_74 = arith.constant 3 : index
    %c0_75 = arith.constant 0 : index
    %c0_76 = arith.constant 0 : index
    %117 = vector.load %arg8[%c3_74, %c0_75, %c0_76] : memref<4x128x128xbf16, #tpu.memory_space<vmem>>, vector<1x128x128xbf16>
    %118 = vector.shape_cast %117 : vector<1x128x128xbf16> to vector<128x128xbf16>
    %119 = arith.truncf %102 : vector<16x128xf32> to vector<16x128xbf16>
    %cst_77 = arith.constant dense<0.000000e+00> : vector<16x128xf32>
    %120 = tpu.matmul %119, %118, %cst_77 {dimension_numbers = #tpu.dot_dimension_numbers<[1], [0], [0], [1], [0, 0, 1, 1], [], []>} : vector<16x128xbf16>, vector<128x128xbf16>, vector<16x128xf32> -> vector<16x128xf32>
    %121 = arith.addf %116, %120 : vector<16x128xf32>
    %c0_78 = arith.constant 0 : index
    %c0_79 = arith.constant 0 : index
    %122 = vector.load %arg9[%c0_78, %c0_79] : memref<1x128xf32, #tpu.memory_space<vmem>>, vector<1x128xf32>
    %123 = vector.broadcast %122 : vector<1x128xf32> to vector<16x128xf32>
    %124 = arith.addf %121, %123 : vector<16x128xf32>
    %c0_80 = arith.constant 0 : index
    %c0_81 = arith.constant 0 : index
    %125 = vector.load %arg10[%c0_80, %c0_81] : memref<16x128xf32, #tpu.memory_space<vmem>>, vector<16x128xf32>
    tpu.vector_store %arg10[%c0_80, %c0_81], %124 {strides = array<i32>} : memref<16x128xf32, #tpu.memory_space<vmem>>, vector<16x128xf32>,
    return
  }
  func.func @transform_0(%arg0: i32) -> (i32, i32) {
    %c0_i32 = arith.constant 0 : i32
    %c0_i32_0 = arith.constant 0 : i32
    %c0_i32_1 = arith.constant 0 : i32
    return %c0_i32, %c0_i32_0 : i32, i32
  }
  func.func @transform_1(%arg0: i32) -> (i32, i32) {
    %c0_i32 = arith.constant 0 : i32
    %c0_i32_0 = arith.constant 0 : i32
    %c0_i32_1 = arith.constant 0 : i32
    return %c0_i32, %c0_i32_0 : i32, i32
  }
  func.func @transform_2(%arg0: i32) -> (i32, i32) {
    %c0_i32 = arith.constant 0 : i32
    %c0_i32_0 = arith.constant 0 : i32
    %c0_i32_1 = arith.constant 0 : i32
    return %c0_i32, %c0_i32_0 : i32, i32
  }
  func.func @transform_3(%arg0: i32) -> (i32, i32) {
    %c0_i32 = arith.constant 0 : i32
    %c0_i32_0 = arith.constant 0 : i32
    %c0_i32_1 = arith.constant 0 : i32
    return %c0_i32, %c0_i32_0 : i32, i32
  }
  func.func @transform_4(%arg0: i32) -> (i32, i32, i32) {
    %c0_i32 = arith.constant 0 : i32
    %c0_i32_0 = arith.constant 0 : i32
    %c0_i32_1 = arith.constant 0 : i32
    %c0_i32_2 = arith.constant 0 : i32
    return %c0_i32, %c0_i32_0, %c0_i32_1 : i32, i32, i32
  }
  func.func @transform_5(%arg0: i32) -> (i32, i32, i32) {
    %c0_i32 = arith.constant 0 : i32
    %c0_i32_0 = arith.constant 0 : i32
    %c0_i32_1 = arith.constant 0 : i32
    %c0_i32_2 = arith.constant 0 : i32
    return %c0_i32, %c0_i32_0, %c0_i32_1 : i32, i32, i32
  }
  func.func @transform_6(%arg0: i32) -> (i32, i32, i32) {
    %c0_i32 = arith.constant 0 : i32
    %c0_i32_0 = arith.constant 0 : i32
    %c0_i32_1 = arith.constant 0 : i32
    %c0_i32_2 = arith.constant 0 : i32
    return %c0_i32, %c0_i32_0, %c0_i32_1 : i32, i32, i32
  }
  func.func @transform_7(%arg0: i32) -> (i32, i32, i32) {
    %c0_i32 = arith.constant 0 : i32
    %c0_i32_0 = arith.constant 0 : i32
    %c0_i32_1 = arith.constant 0 : i32
    %c0_i32_2 = arith.constant 0 : i32
    return %c0_i32, %c0_i32_0, %c0_i32_1 : i32, i32, i32
  }
  func.func @transform_8(%arg0: i32) -> (i32, i32) {
    %c0_i32 = arith.constant 0 : i32
    %c0_i32_0 = arith.constant 0 : i32
    %c0_i32_1 = arith.constant 0 : i32
    return %c0_i32, %c0_i32_0 : i32, i32
  }
  func.func @transform_9(%arg0: i32) -> (i32, i32) {
    %c0_i32 = arith.constant 0 : i32
    %c0_i32_0 = arith.constant 0 : i32
    %c0_i32_1 = arith.constant 0 : i32
    return %c0_i32, %c0_i32_0 : i32, i32
  }
}

</mosaic_0001>

<bundles_post_ra>
// kernel: tpu_custom_call.1
= control target key start
LH: loop header
LB: loop body
LE: loop exit
PB: predicated region body
PF: predicated region fallthrough
CT: control target
= control target key end

     0   :  { %14 = vsyncpa [#allocation3], 0  ;;  %s1828_s0 = inlined_call_operand.hbm [shape: bf16[16,16], index: 0, kind: input, shape index: {}]   ;;  %s1829_s1 = inlined_call_operand.hbm [shape: bf16[16,128], index: 1, kind: input, shape index: {}]   ;;  %s1830_s2 = inlined_call_operand.hbm [shape: bf16[128,128], index: 2, kind: input, shape index: {}]   ;;  %s1831_s3 = inlined_call_operand.hbm [shape: f32[1,128], index: 3, kind: input, shape index: {}]   ;;  %s1832_s4 = inlined_call_operand.hbm [shape: bf16[4,128,128], index: 4, kind: input, shape index: {}]   ;;  %s1833_s5 = inlined_call_operand.vmem [shape: f32[4,1,128], index: 5, kind: input, shape index: {}]   ;;  %s1834_s6 = inlined_call_operand.hbm [shape: f32[4,1,128], index: 6, kind: input, shape index: {}]   ;;  %s1835_s7 = inlined_call_operand.hbm [shape: bf16[4,128,128], index: 7, kind: input, shape index: {}]   ;;  %s1836_s8 = inlined_call_operand.vmem [shape: f32[1,128], index: 8, kind: input, shape index: {}]   ;;  %s1837_s9 = inlined_call_operand.hbm [shape: f32[16,128], index: 9, kind: output, shape index: {}]  }
   0x1   :  { %15 = vsyncpa [#allocation6], 0 }
   0x2   :  { %16 = vsyncpa [#allocation9], 0 }
   0x3   :  { %17 = vsyncpa [#allocation12], 0 }
   0x4   :  { %18 = vsyncpa [#allocation4], 0  ;;  %s36_s11 = sshll.u32 %s1829_s1, 4  ;;  %s1678_s12 = smov [#allocation5]   ;;  %s37_s11 = int_to_ptr.hbm [resolvable:$true] %s36_s11 }
   0x5   :  { %s38_s13 = sshll.u32 %s1678_s12, 4  ;;  %s63_s16 = sshll.u32 %s1831_s3, 4  ;;  %s39_s13 = int_to_ptr.vmem [resolvable:$true] %s38_s13  ;;  %s64_s16 = int_to_ptr.hbm [resolvable:$true] %s63_s16 }
   0x6   :  { %s1679_s17 = smov 64   ;;  %s1680_s18 = smov 4  }
   0x7   :  { %44 = dma.hbm_to_vmem [thread:$0]  %s37_s11, 128, %s39_s13, [#allocation6], %s1679_s17, %s1679_s17, %s1680_s18  }
   0x8   :  { %s1681_s19 = smov [#allocation8]   ;;  %s88_s1 = sshll.u32 %s1834_s6, 4  ;;  %s89_s1 = int_to_ptr.hbm [resolvable:$true] %s88_s1 }
   0x9   :  { %s65_s20 = sshll.u32 %s1681_s19, 4  ;;  %s1682_s23 = smov [#allocation11]   ;;  %s66_s20 = int_to_ptr.vmem [resolvable:$true] %s65_s20 }
   0xa   :  { %68 = dma.hbm_to_vmem [thread:$0]  %s64_s16, 16, %s66_s20, [#allocation9]  }
   0xb   :  { %s90_s24 = sshll.u32 %s1682_s23, 4  ;;  %s23_s26 = sshll.u32 %s1828_s0, 4  ;;  %s91_s24 = int_to_ptr.vmem [resolvable:$true] %s90_s24  ;;  %s24_s26 = int_to_ptr.hbm [resolvable:$true] %s23_s26 }
   0xc   :  { %s1683_s27 = smov 16   ;;  %s1684_s28 = smov 1  }
   0xd   :  { %96 = dma.hbm_to_vmem [thread:$0]  %s89_s1, 64, %s91_s24, [#allocation12], %s1683_s27, %s1683_s27, %s1684_s28  }
   0xe   :  { %s1685_s29 = smov [#allocation2]   ;;  %s49_s6 = sshll.u32 %s1830_s2, 4  ;;  %s50_s6 = int_to_ptr.hbm [resolvable:$true] %s49_s6 }
   0xf   :  { %s25_s30 = sshll.u32 %s1685_s29, 4  ;;  %s73_s0 = sshll.u32 %s1832_s4, 4  ;;  %s26_s30 = int_to_ptr.vmem [resolvable:$true] %s25_s30  ;;  %s74_s0 = int_to_ptr.hbm [resolvable:$true] %s73_s0 }
  0x10   :  { %31 = dma.hbm_to_vmem [thread:$0]  %s24_s26, 128, %s26_s30, [#allocation3], %s1679_s17, %s1679_s17, %s1680_s18  }
  0x11   :  { %s1686_s14 = smov [#allocation7]   ;;  %s1687_s16 = smov [#allocation10]  }
  0x12   :  { %s51_s15 = sshll.u32 %s1686_s14, 4  ;;  %s75_s2 = sshll.u32 %s1687_s16, 4  ;;  %s52_s15 = int_to_ptr.vmem [resolvable:$true] %s51_s15  ;;  %s76_s2 = int_to_ptr.vmem [resolvable:$true] %s75_s2 }
  0x13   :  { %57 = dma.hbm_to_vmem [thread:$0]  %s50_s6, 1024, %s52_s15, [#allocation6], %s1679_s17, %s1679_s17, %s1680_s18  }
  0x14   :  { %s101_s21 = sshll.u32 %s1835_s7, 4  ;;  %s1688_s4 = smov [#allocation13]   ;;  %s102_s21 = int_to_ptr.hbm [resolvable:$true] %s101_s21 }
  0x15   :  { %81 = dma.hbm_to_vmem [thread:$0]  %s74_s0, 4096, %s76_s2, [#allocation9], %s1679_s17, %s1679_s17, %s1680_s18  }
  0x16   :  { %s103_s22 = sshll.u32 %s1688_s4, 4  ;;  %s104_s22 = int_to_ptr.vmem [resolvable:$true] %s103_s22 }
  0x17   :  { %109 = dma.hbm_to_vmem [thread:$0]  %s102_s21, 4096, %s104_s22, [#allocation12], %s1679_s17, %s1679_s17, %s1680_s18  }
  0x18   :  { %1668 = dma.done.wait [#allocation3], 128  }
  0x19   :  { %1669 = vsyncadd [#allocation3], 4294967168 }
  0x1a   :  { %1670 = dma.done.wait [#allocation6], 1152  }
  0x1b   :  { %1671 = vsyncadd [#allocation6], 4294966144 }
  0x1c   :  { %1672 = dma.done.wait [#allocation9], 4112  }
  0x1d   :  { %1673 = vsyncadd [#allocation9], 4294963184 }
  0x1e   :  { %1674 = dma.done.wait [#allocation12], 4160  }
  0x1f   :  { %1675 = vsyncadd [#allocation12], 4294963136  ;;  %v1381_v0 = vld [vmem:[#allocation5] sm:$0xff]  ;;  %v1778_v2 = vld [vmem:[#allocation2] sm:$0xff]  ;;  %vm172_vm0 = vcmask 130048   ;;  %s1689_s25 = smov [#allocation14]  }
  0x20   :  { %v1389_v1 = vld [vmem:[#allocation7 + $0x38] sm:$0xff]  ;;  %183 = vmatpush.bf16.msra.mxu2 %v1381_v0  ;;  %v1388_v3 = vld [vmem:[#allocation7 + $0x30] sm:$0xff]  ;;  %v1387_v4 = vld [vmem:[#allocation7 + $0x28] sm:$0xff]  ;;  %s1059_s26 = sshll.u32 %s1689_s25, 4  ;;  %s1061_s29 = sshll.u32 %s1837_s9, 4  ;;  %s1060_s26 = int_to_ptr.vmem [resolvable:$true] %s1059_s26  ;;  %s1062_s29 = int_to_ptr.hbm [resolvable:$true] %s1061_s29 }
  0x21   :  { %243 = vmatpush.bf16.msra.mxu1 %v1389_v1  ;;  %v1386_v5 = vld [vmem:[#allocation7 + $0x20] sm:$0xff]  ;;  %v1385_v6 = vld [vmem:[#allocation7 + $0x18] sm:$0xff]  ;;  %v1384_v7 = vld [vmem:[#allocation7 + $0x10] sm:$0xff]  ;;  %s1691_s30 = smov 8  }
  0x22   :  { %v1383_v8 = vld [vmem:[#allocation7 + $0x8] sm:$0xff]  ;;  %v1382_v9 = vld [vmem:[#allocation7] sm:$0xff]  ;;  %v1396_v14 = vld [vmem:[#allocation10 + $0x30] sm:$0xff] }
  0x23   :  { %1085 = vmatmul.msk.bf16.vlgmr.msra.gmra.mxu2 %vm172_vm0, %v1778_v2  ;;  %v1397_v13 = vld [vmem:[#allocation10 + $0x38] sm:$0xff]  ;;  %v1395_v15 = vld [vmem:[#allocation10 + $0x28] sm:$0xff]  ;;  %v1394_v16 = vld [vmem:[#allocation10 + $0x20] sm:$0xff] }
  0x24   :  { %345 = vmatpush.bf16.msra.mxu3 %v1397_v13  ;;  %v1468_v18 = vld [vmem:[#allocation8] ss:$0 sm:$0xff]  ;;  %v1392_v24 = vld [vmem:[#allocation10 + $0x10] sm:$0xff]  ;;  %v1391_v25 = vld [vmem:[#allocation10 + $0x8] sm:$0xff] }
  0x25   :  { %244 = vmatpush.bf16.msra.mxu1 %v1388_v3  ;;  %v1393_v23 = vld [vmem:[#allocation10 + $0x18] sm:$0xff]  ;;  %v1390_v26 = vld [vmem:[#allocation10] sm:$0xff]  ;;  %v1404_v37 = vld [vmem:[#allocation10 + $0x70] sm:$0xff] }
  0x26   :  { %v1405_v36 = vld [vmem:[#allocation10 + $0x78] sm:$0xff]  ;;  %v1403_v38 = vld [vmem:[#allocation10 + $0x68] sm:$0xff]  ;;  %v1402_v41 = vld [vmem:[#allocation10 + $0x60] sm:$0xff] }
  0x27   :  { %v1469_v44 = vld [vmem:[%s1833_s5] ss:$0 sm:$0xff]  ;;  %v1470_v49 = vld [vmem:[#allocation11] ss:$0 sm:$0xff]  ;;  %v1401_v58 = vld [vmem:[#allocation10 + $0x58] sm:$0xff] }
  0x28   :  { %346 = vmatpush.bf16.msra.mxu3 %v1396_v14  ;;  %v1400_v59 = vld [vmem:[#allocation10 + $0x50] sm:$0xff]  ;;  %v1399_v60 = vld [vmem:[#allocation10 + $0x48] sm:$0xff]  ;;  %v1398_v61 = vld [vmem:[#allocation10 + $0x40] sm:$0xff] }
  0x29   :  { %245 = vmatpush.bf16.msra.mxu1 %v1387_v4  ;;  %v1437_v62 = vld [vmem:[#allocation13 + $0x78] sm:$0xff]  ;;  %v1436_v63 = vld [vmem:[#allocation13 + $0x70] sm:$0xff]  ;;  %v1435_v0 = vld [vmem:[#allocation13 + $0x68] sm:$0xff] }
  0x2a   :  { %v1434_v1 = vld [vmem:[#allocation13 + $0x60] sm:$0xff]  ;;  %v1413_v14 = vld [vmem:[#allocation10 + $0xb8] sm:$0xff] }
  0x2b   :  { %v1430_v13 = vld [vmem:[#allocation13 + $0x40] sm:$0xff] }
  0x2c   :  { %347 = vmatpush.bf16.msra.mxu3 %v1395_v15  ;;  %v1412_v15 = vld [vmem:[#allocation10 + $0xb0] sm:$0xff] }
  0x2d   :  { %246 = vmatpush.bf16.msra.mxu1 %v1386_v5 }
  0x30   :  { %348 = vmatpush.bf16.msra.mxu3 %v1394_v16  ;;  %v1411_v16 = vld [vmem:[#allocation10 + $0xa8] sm:$0xff] }
  0x31   :  { %247 = vmatpush.bf16.msra.mxu1 %v1385_v6 }
  0x34   :  { %349 = vmatpush.bf16.msra.mxu3 %v1393_v23 }
  0x35   :  { %248 = vmatpush.bf16.msra.mxu1 %v1384_v7 }
  0x38   :  { %350 = vmatpush.bf16.msra.mxu3 %v1392_v24 }
  0x39   :  { %249 = vmatpush.bf16.msra.mxu1 %v1383_v8 }
  0x3c   :  { %351 = vmatpush.bf16.msra.mxu3 %v1391_v25 }
  0x3d   :  { %250 = vmatpush.bf16.msra.mxu1 %v1382_v9 }
  0x40   :  { %352 = vmatpush.bf16.msra.mxu3 %v1390_v26 }
  0x41   :  { %585 = vmatpush.bf16.msrb.mxu1 %v1413_v14  ;;  %v1429_v14 = vld [vmem:[#allocation13 + $0x38] sm:$0xff] }
  0x45   :  { %586 = vmatpush.bf16.msrb.mxu1 %v1412_v15 }
  0x49   :  { %587 = vmatpush.bf16.msrb.mxu1 %v1411_v16  ;;  %v1421_v16 = vld [vmem:[#allocation10 + $0xf8] sm:$0xff] }
  0xa6   :  { %v185_v10 = vpop.f32.mrf.mxu2 }
  0xae   :  { %v187_v11 = vpop.f32.mrf.mxu2 }
  0xaf   :  { %v190_v12 = vpack.c.bf16 %v187_v11, %v185_v10  ;;  %v1433_v10 = vld [vmem:[#allocation13 + $0x58] sm:$0xff]  ;;  %v1432_v11 = vld [vmem:[#allocation13 + $0x50] sm:$0xff] }
  0xb1   :  { %251 = vmatmul.bf16.vlgmr.msra.gmra.mxu1 %v190_v12  ;;  %v1431_v12 = vld [vmem:[#allocation13 + $0x48] sm:$0xff] }
 0x12e   :  { %v252_v17 = vpop.f32.mrf.mxu1 }
 0x12f   :  { %v253_v20 = vadd.f32 %v1468_v18, %v252_v17 }
 0x131   :  { %v1784_v30 = vmul.f32 0.1, %v253_v20 }
 0x136   :  { %v254_v19 = vpop.f32.mrf.mxu1 }
 0x137   :  { %v255_v21 = vadd.f32 %v1468_v18, %v254_v19  ;;  %v1410_v19 = vld [vmem:[#allocation10 + $0xa0] sm:$0xff] }
 0x138   :  { %588 = vmatpush.bf16.msrb.mxu1 %v1410_v19  ;;  %v1426_v19 = vld [vmem:[#allocation13 + $0x20] sm:$0xff] }
 0x139   :  { %v257_v22 = vpack.c.bf16 %v255_v21, %v253_v20  ;;  %v1786_v31 = vmul.f32 0.1, %v255_v21 }
 0x13b   :  { %265 = vmatpush.bf16.msrb.mxu2 %v257_v22  ;;  %v1471_v22 = vld [vmem:[%s1833_s5 + $0x1] ss:$0 sm:$0xff] }
 0x13e   :  { %1118 = vmatmul.msk.bf16.vlgmr.msrb.gmra.mxu2 %vm172_vm0, %v1778_v2 }
 0x13f   :  { %464 = vmatpush.bf16.msra.mxu2 %v1405_v36 }
 0x143   :  { %465 = vmatpush.bf16.msra.mxu2 %v1404_v37 }
 0x147   :  { %466 = vmatpush.bf16.msra.mxu2 %v1403_v38  ;;  %v1409_v38 = vld [vmem:[#allocation10 + $0x98] sm:$0xff] }
 0x148   :  { %589 = vmatpush.bf16.msrb.mxu1 %v1409_v38 }
 0x14b   :  { %467 = vmatpush.bf16.msra.mxu2 %v1402_v41  ;;  %v1406_v41 = vld [vmem:[#allocation10 + $0x80] sm:$0xff] }
 0x14f   :  { %468 = vmatpush.bf16.msra.mxu2 %v1401_v58  ;;  %v1439_v58 = vld [vmem:[#allocation13 + $0x88] sm:$0xff] }
 0x153   :  { %469 = vmatpush.bf16.msra.mxu2 %v1400_v59  ;;  %v1438_v59 = vld [vmem:[#allocation13 + $0x80] sm:$0xff] }
 0x157   :  { %470 = vmatpush.bf16.msra.mxu2 %v1399_v60 }
 0x15b   :  { %471 = vmatpush.bf16.msra.mxu2 %v1398_v61 }
 0x15f   :  { %807 = vmatpush.bf16.msrb.mxu2 %v1437_v62 }
 0x163   :  { %808 = vmatpush.bf16.msrb.mxu2 %v1436_v63 }
 0x167   :  { %809 = vmatpush.bf16.msrb.mxu2 %v1435_v0  ;;  %v1473_v0 = vld [vmem:[%s1833_s5 + $0x2] ss:$0 sm:$0xff] }
 0x16b   :  { %810 = vmatpush.bf16.msrb.mxu2 %v1434_v1 }
 0x16f   :  { %811 = vmatpush.bf16.msrb.mxu2 %v1433_v10 }
 0x173   :  { %812 = vmatpush.bf16.msrb.mxu2 %v1432_v11 }
 0x177   :  { %813 = vmatpush.bf16.msrb.mxu2 %v1431_v12 }
 0x17b   :  { %814 = vmatpush.bf16.msrb.mxu2 %v1430_v13 }
 0x1c1   :  { %v267_v27 = vpop.f32.mrf.mxu2 }
 0x1c2   :  { %v272_v28 = vmul.f32 0.9, %v267_v27  ;;  %v1472_v27 = vld [vmem:[#allocation11 + $0x1] ss:$0 sm:$0xff] }
 0x1c4   :  { %v276_v33 = vadd.f32 %v1784_v30, %v272_v28 }
 0x1c6   :  { %v278_v42 = vmul.f32 0.5945349, %v276_v33 }
 0x1c9   :  { %v269_v29 = vpop.f32.mrf.mxu2 }
 0x1ca   :  { %v273_v32 = vmul.f32 0.9, %v269_v29 }
 0x1cc   :  { %v277_v34 = vadd.f32 %v1786_v31, %v273_v32 }
 0x1ce   :  { %v296_v35 = vpack.c.bf16 %v277_v34, %v276_v33  ;;  %v279_v46 = vmul.f32 0.5945349, %v277_v34 }
 0x1d0   :  { %353 = vmatmul.bf16.vlgmr.msra.gmra.mxu3 %v296_v35 }
 0x253   :  { %v354_v39 = vpop.f32.mrf.mxu3 }
 0x254   :  { %v359_v40 = vmul.f32 0.4054651, %v354_v39  ;;  %v1408_v39 = vld [vmem:[#allocation10 + $0x90] sm:$0xff] }
 0x255   :  { %590 = vmatpush.bf16.msrb.mxu1 %v1408_v39  ;;  %v1450_v39 = vld [vmem:[#allocation13 + $0xe0] sm:$0xff] }
 0x256   :  { %v1790_v43 = vadd.f32 %v359_v40, %v278_v42  ;;  %v1407_v40 = vld [vmem:[#allocation10 + $0x88] sm:$0xff]  ;;  %v1445_v42 = vld [vmem:[#allocation13 + $0xb8] sm:$0xff] }
 0x258   :  { %v367_v48 = vmul.f32 %v1469_v44, %v1790_v43 }
 0x259   :  { %591 = vmatpush.bf16.msrb.mxu1 %v1407_v40  ;;  %v1449_v40 = vld [vmem:[#allocation13 + $0xd8] sm:$0xff] }
 0x25a   :  { %v373_v53 = vadd.f32 %v1470_v49, %v367_v48 }
 0x25b   :  { %v356_v45 = vpop.f32.mrf.mxu3 }
 0x25c   :  { %v360_v47 = vmul.f32 0.4054651, %v356_v45  ;;  %v375_v55 = vmax.f32 %v373_v53, 0.0  ;;  %v1443_v45 = vld [vmem:[#allocation13 + $0xa8] sm:$0xff] }
 0x25d   :  { %592 = vmatpush.bf16.msrb.mxu1 %v1406_v41  ;;  %v1448_v41 = vld [vmem:[#allocation13 + $0xd0] sm:$0xff] }
 0x25e   :  { %v1796_v50 = vadd.f32 %v360_v47, %v279_v46  ;;  %v1442_v46 = vld [vmem:[#allocation13 + $0xa0] sm:$0xff] }
 0x260   :  { %v740_v51 = vpack.c.bf16 %v1796_v50, %v1790_v43  ;;  %v368_v52 = vmul.f32 %v1469_v44, %v1796_v50  ;;  %v1444_v44 = vld [vmem:[#allocation13 + $0xb0] sm:$0xff] }
 0x261   :  { %949 = vmatpush.bf16.msra.mxu1 %v1445_v42  ;;  %v1452_v43 = vld [vmem:[#allocation13 + $0xf0] sm:$0xff]  ;;  %v1447_v42 = vld [vmem:[#allocation13 + $0xc8] sm:$0xff] }
 0x262   :  { %v374_v54 = vadd.f32 %v1470_v49, %v368_v52 }
 0x264   :  { %v376_v56 = vmax.f32 %v374_v54, 0.0 }
 0x265   :  { %950 = vmatpush.bf16.msra.mxu1 %v1444_v44  ;;  %v1446_v44 = vld [vmem:[#allocation13 + $0xc0] sm:$0xff] }
 0x266   :  { %v377_v57 = vpack.c.bf16 %v376_v56, %v375_v55  ;;  %v1441_v56 = vld [vmem:[#allocation13 + $0x98] sm:$0xff] }
 0x268   :  { %385 = vmatpush.bf16.msra.mxu0 %v377_v57  ;;  %v1440_v57 = vld [vmem:[#allocation13 + $0x90] sm:$0xff] }
 0x269   :  { %951 = vmatpush.bf16.msra.mxu1 %v1443_v45 }
 0x26b   :  { %1151 = vmatmul.msk.bf16.vlgmr.msra.gmra.mxu0 %vm172_vm0, %v1778_v2 }
 0x26d   :  { %952 = vmatpush.bf16.msra.mxu1 %v1442_v46 }
 0x271   :  { %953 = vmatpush.bf16.msra.mxu1 %v1441_v56 }
 0x275   :  { %954 = vmatpush.bf16.msra.mxu1 %v1440_v57 }
 0x279   :  { %955 = vmatpush.bf16.msra.mxu1 %v1439_v58 }
 0x27d   :  { %956 = vmatpush.bf16.msra.mxu1 %v1438_v59  ;;  %v1475_v59 = vld [vmem:[%s1836_s8] ss:$0 sm:$0xff]  ;;  %s1690_s8 = smov 128  }
 0x2e8   :  { %v387_v3 = vpop.f32.mrf.mxu0 }
 0x2e9   :  { %v392_v4 = vmul.f32 0.9, %v387_v3 }
 0x2eb   :  { %v394_v7 = vadd.f32 %v392_v4, %v1784_v30 }
 0x2ed   :  { %v396_v20 = vmul.f32 0.7768564, %v394_v7 }
 0x2f0   :  { %v389_v5 = vpop.f32.mrf.mxu0 }
 0x2f1   :  { %v393_v6 = vmul.f32 0.9, %v389_v5 }
 0x2f3   :  { %v395_v8 = vadd.f32 %v393_v6, %v1786_v31  ;;  %v1474_v6 = vld [vmem:[#allocation11 + $0x2] ss:$0 sm:$0xff] }
 0x2f5   :  { %v415_v9 = vpack.c.bf16 %v395_v8, %v394_v7  ;;  %v397_v25 = vmul.f32 0.7768564, %v395_v8 }
 0x2f7   :  { %472 = vmatmul.bf16.vlgmr.msra.gmra.mxu2 %v415_v9 }
 0x37a   :  { %v473_v17 = vpop.f32.mrf.mxu2 }
 0x37b   :  { %v478_v18 = vmul.f32 0.22314355, %v473_v17  ;;  %v1428_v17 = vld [vmem:[#allocation13 + $0x30] sm:$0xff] }
 0x37d   :  { %v480_v21 = vadd.f32 %v478_v18, %v396_v20  ;;  %v1427_v18 = vld [vmem:[#allocation13 + $0x28] sm:$0xff]  ;;  %v1425_v20 = vld [vmem:[#allocation13 + $0x18] sm:$0xff] }
 0x37f   :  { %v487_v24 = vmul.f32 %v1471_v22, %v480_v21 }
 0x381   :  { %v494_v33 = vadd.f32 %v1472_v27, %v487_v24  ;;  %v1420_v24 = vld [vmem:[#allocation10 + $0xf0] sm:$0xff] }
 0x382   :  { %v475_v23 = vpop.f32.mrf.mxu2 }
 0x383   :  { %v479_v26 = vmul.f32 0.22314355, %v475_v23  ;;  %v496_v35 = vmax.f32 %v494_v33, 0.0  ;;  %v1422_v23 = vld [vmem:[#allocation13] sm:$0xff]  ;;  %v1453_v33 = vld [vmem:[#allocation13 + $0xf8] sm:$0xff] }
 0x385   :  { %v481_v28 = vadd.f32 %v479_v26, %v397_v25  ;;  %v1418_v25 = vld [vmem:[#allocation10 + $0xe0] sm:$0xff]  ;;  %v1417_v26 = vld [vmem:[#allocation10 + $0xd8] sm:$0xff] }
 0x387   :  { %v488_v29 = vmul.f32 %v1471_v22, %v481_v28  ;;  %v758_v32 = vpack.c.bf16 %v481_v28, %v480_v21  ;;  %v1424_v21 = vld [vmem:[#allocation13 + $0x10] sm:$0xff]  ;;  %v1423_v22 = vld [vmem:[#allocation13 + $0x8] sm:$0xff] }
 0x388   :  { %v1415_v28 = vld [vmem:[#allocation10 + $0xc8] sm:$0xff] }
 0x389   :  { %815 = vmatmul.bf16.vlgmr.msrb.gmra.mxu2 %v758_v32  ;;  %v495_v34 = vadd.f32 %v1472_v27, %v488_v29  ;;  %v1416_v27 = vld [vmem:[#allocation10 + $0xd0] sm:$0xff]  ;;  %v1414_v29 = vld [vmem:[#allocation10 + $0xc0] sm:$0xff] }
 0x38b   :  { %v497_v36 = vmax.f32 %v495_v34, 0.0 }
 0x38d   :  { %v498_v37 = vpack.c.bf16 %v497_v36, %v496_v35 }
 0x38f   :  { %506 = vmatpush.bf16.msrb.mxu0 %v498_v37  ;;  %v1451_v37 = vld [vmem:[#allocation13 + $0xe8] sm:$0xff] }
 0x392   :  { %1185 = vmatmul.msk.bf16.vlgmr.msrb.gmra.mxu0 %vm172_vm0, %v1778_v2 }
 0x393   :  { %706 = vmatpush.bf16.msra.mxu0 %v1421_v16 }
 0x397   :  { %707 = vmatpush.bf16.msra.mxu0 %v1420_v24 }
 0x40f   :  { %v508_v47 = vpop.f32.mrf.mxu0 }
 0x410   :  { %v513_v48 = vmul.f32 0.9, %v508_v47 }
 0x412   :  { %v515_v53 = vadd.f32 %v513_v48, %v1784_v30 }
 0x414   :  { %v517_v62 = vmul.f32 0.84584934, %v515_v53 }
 0x417   :  { %v510_v49 = vpop.f32.mrf.mxu0 }
 0x418   :  { %v514_v52 = vmul.f32 0.9, %v510_v49 }
 0x41a   :  { %v516_v54 = vadd.f32 %v514_v52, %v1786_v31 }
 0x41c   :  { %v536_v55 = vpack.c.bf16 %v516_v54, %v515_v53  ;;  %v518_v4 = vmul.f32 0.84584934, %v516_v54 }
 0x41e   :  { %593 = vmatmul.bf16.vlgmr.msrb.gmra.mxu1 %v536_v55  ;;  %v816_v55 = vpop.f32.mrf.mxu2 }
 0x49b   :  { %v594_v60 = vpop.f32.mrf.mxu1 }
 0x49c   :  { %v599_v61 = vmul.f32 0.15415068, %v594_v60 }
 0x49e   :  { %v601_v63 = vadd.f32 %v599_v61, %v517_v62 }
 0x4a0   :  { %v608_v3 = vmul.f32 %v1473_v0, %v601_v63 }
 0x4a2   :  { %v615_v10 = vadd.f32 %v1474_v6, %v608_v3 }
 0x4a3   :  { %v596_v1 = vpop.f32.mrf.mxu1 }
 0x4a4   :  { %v600_v5 = vmul.f32 0.15415068, %v596_v1  ;;  %v617_v12 = vmax.f32 %v615_v10, 0.0 }
 0x4a6   :  { %v602_v7 = vadd.f32 %v600_v5, %v518_v4 }
 0x4a8   :  { %v609_v8 = vmul.f32 %v1473_v0, %v602_v7  ;;  %v900_v9 = vpack.c.bf16 %v602_v7, %v601_v63  ;;  %v818_v63 = vpop.f32.mrf.mxu2 }
 0x4aa   :  { %957 = vmatmul.bf16.vlgmr.msra.gmra.mxu1 %v900_v9  ;;  %v616_v11 = vadd.f32 %v1474_v6, %v609_v8 }
 0x4ac   :  { %v618_v13 = vmax.f32 %v616_v11, 0.0 }
 0x4ae   :  { %v619_v15 = vpack.c.bf16 %v618_v13, %v617_v12 }
 0x4b0   :  { %627 = vmatpush.bf16.msrb.mxu3 %v619_v15 }
 0x4b3   :  { %1219 = vmatmul.msk.bf16.vlgmr.msrb.gmra.mxu3 %vm172_vm0, %v1778_v2  ;;  %v1419_v2 = vld [vmem:[#allocation10 + $0xe8] sm:$0xff] }
 0x4b4   :  { %869 = vmatpush.bf16.msra.mxu3 %v1429_v14  ;;  %708 = vmatpush.bf16.msra.mxu0 %v1419_v2 }
 0x4b8   :  { %870 = vmatpush.bf16.msra.mxu3 %v1428_v17  ;;  %709 = vmatpush.bf16.msra.mxu0 %v1418_v25 }
 0x4bc   :  { %871 = vmatpush.bf16.msra.mxu3 %v1427_v18  ;;  %710 = vmatpush.bf16.msra.mxu0 %v1417_v26 }
 0x4c0   :  { %872 = vmatpush.bf16.msra.mxu3 %v1426_v19  ;;  %711 = vmatpush.bf16.msra.mxu0 %v1416_v27 }
 0x4c4   :  { %873 = vmatpush.bf16.msra.mxu3 %v1425_v20  ;;  %712 = vmatpush.bf16.msra.mxu0 %v1415_v28 }
 0x4c8   :  { %874 = vmatpush.bf16.msra.mxu3 %v1424_v21  ;;  %713 = vmatpush.bf16.msra.mxu0 %v1414_v29 }
 0x4cc   :  { %875 = vmatpush.bf16.msra.mxu3 %v1423_v22  ;;  %1031 = vmatpush.bf16.msrb.mxu0 %v1453_v33 }
 0x4d0   :  { %876 = vmatpush.bf16.msra.mxu3 %v1422_v23  ;;  %1032 = vmatpush.bf16.msrb.mxu0 %v1452_v43 }
 0x4d3   :  { %877 = vmatmul.bf16.vlgmr.msra.gmra.mxu3 %v740_v51 }
 0x4d4   :  { %1033 = vmatpush.bf16.msrb.mxu0 %v1451_v37 }
 0x4d8   :  { %1034 = vmatpush.bf16.msrb.mxu0 %v1450_v39 }
 0x4dc   :  { %1035 = vmatpush.bf16.msrb.mxu0 %v1449_v40 }
 0x4e0   :  { %1036 = vmatpush.bf16.msrb.mxu0 %v1448_v41 }
 0x4e4   :  { %1037 = vmatpush.bf16.msrb.mxu0 %v1447_v42 }
 0x4e8   :  { %1038 = vmatpush.bf16.msrb.mxu0 %v1446_v44 }
 0x527   :  { %v958_v57 = vpop.f32.mrf.mxu1 }
 0x52f   :  { %v960_v3 = vpop.f32.mrf.mxu1 }
 0x536   :  { %v629_v32 = vpop.f32.mrf.mxu3 }
 0x537   :  { %v634_v34 = vmul.f32 0.9, %v629_v32 }
 0x539   :  { %v636_v51 = vadd.f32 %v634_v34, %v1784_v30 }
 0x53b   :  { %v638_v47 = vmul.f32 0.882217, %v636_v51 }
 0x53e   :  { %v631_v35 = vpop.f32.mrf.mxu3 }
 0x53f   :  { %v635_v50 = vmul.f32 0.9, %v631_v35 }
 0x541   :  { %v637_v36 = vadd.f32 %v635_v50, %v1786_v31 }
 0x543   :  { %v657_v38 = vpack.c.bf16 %v637_v36, %v636_v51  ;;  %v639_v31 = vmul.f32 0.882217, %v637_v36 }
 0x545   :  { %714 = vmatmul.bf16.vlgmr.msra.gmra.mxu0 %v657_v38 }
 0x556   :  { %v878_v54 = vpop.f32.mrf.mxu3 }
 0x557   :  { %v879_v56 = vadd.f32 %v878_v54, %v816_v55 }
 0x559   :  { %v963_v58 = vadd.f32 %v958_v57, %v879_v56 }
 0x55e   :  { %v880_v60 = vpop.f32.mrf.mxu3 }
 0x55f   :  { %v881_v0 = vadd.f32 %v880_v60, %v818_v63 }
 0x561   :  { %v964_v4 = vadd.f32 %v960_v3, %v881_v0 }
 0x5c2   :  { %v715_v45 = vpop.f32.mrf.mxu0 }
 0x5c3   :  { %v720_v46 = vmul.f32 0.11778303, %v715_v45 }
 0x5c5   :  { %v722_v49 = vadd.f32 %v720_v46, %v638_v47 }
 0x5ca   :  { %v717_v30 = vpop.f32.mrf.mxu0 }
 0x5cb   :  { %v721_v48 = vmul.f32 0.11778303, %v717_v30 }
 0x5cd   :  { %v723_v52 = vadd.f32 %v721_v48, %v639_v31 }
 0x5cf   :  { %v982_v53 = vpack.c.bf16 %v723_v52, %v722_v49 }
 0x5d1   :  { %1039 = vmatmul.bf16.vlgmr.msrb.gmra.mxu0 %v982_v53 }
 0x64e   :  { %v1040_v61 = vpop.f32.mrf.mxu0 }
 0x64f   :  { %v1045_v62 = vadd.f32 %v1040_v61, %v963_v58 }
 0x651   :  { %v1051_v1 = vadd.f32 %v1475_v59, %v1045_v62 }
 0x653   :  { %1053 = vst [vmem:[#allocation14] sm:$0xff] %v1051_v1 }
 0x656   :  { %v1042_v5 = vpop.f32.mrf.mxu0 }
 0x657   :  { %v1046_v6 = vadd.f32 %v1042_v5, %v964_v4 }
 0x659   :  { %v1052_v7 = vadd.f32 %v1475_v59, %v1046_v6 }
 0x65b   :  { %1054 = vst [vmem:[#allocation14 + $0x8] sm:$0xff] %v1052_v7 }
 0x65c   :  { %1067 = dma.vmem_to_hbm [thread:$0]  %s1060_s26, 256, %s1062_s29, [#allocation4], %s1690_s8, %s1690_s8, %s1691_s30  }
 0x65d   :  { %1676 = dma.done.wait [#allocation4], 256  }
 0x65e   :  { %1677 = vsyncadd [#allocation4], 4294967040 }
 0x65f   :  { %1072 = vsyncpa [#allocation3], 1 }
 0x660   :  { %1073 = vsyncpa [#allocation6], 1 }
 0x661   :  { %1074 = vsyncpa [#allocation9], 1 }
 0x662   :  { %1075 = vsyncpa [#allocation12], 1 }
 0x663   :  { %1076 = vsyncpa [#allocation4], 1 }

</bundles_post_ra>
